<compile_context>
chip_gen: v7x
topology: tpu7x:2x2x1
jax: 0.10.0
libtpu: 0.0.40
codegen_flags: <defaults>
</compile_context>

<pallas_src>
from functools import partial

import jax
import jax.numpy as jnp
from jax.experimental import pallas as pl
from jax.experimental.pallas import tpu as pltpu


# ---------------------------------------------------------------------------
# Generation-aware VMEM budget
# ---------------------------------------------------------------------------
_VMEM_LIMIT_CACHE = None


def _vmem_limit_bytes():
    """Scoped-VMEM limit derived from the chip's physical VMEM capacity.

    ~96 MiB on v5e/v6e (128 MiB physical), ~48 MiB on v7x (64 MiB per TC).
    Falls back to a conservative 48 MiB if the query is unavailable.
    """
    global _VMEM_LIMIT_CACHE
    if _VMEM_LIMIT_CACHE is not None:
        return _VMEM_LIMIT_CACHE
    try:
        cap = getattr(pltpu.get_tpu_info(), "vmem_capacity_bytes", None)
    except Exception:
        cap = None
    if not cap:
        cap = 64 * 1024 * 1024
    limit = max(32 * 1024 * 1024, min(int(cap) * 3 // 4, 96 * 1024 * 1024))
    _VMEM_LIMIT_CACHE = limit
    return limit


def _sublane(itemsize):
    """Channel-tile granularity matching the packed sublane tile per dtype."""
    return {4: 8, 2: 16, 1: 32}.get(int(itemsize), 8)


# ---------------------------------------------------------------------------
# Tile-size helpers
# ---------------------------------------------------------------------------
def _fused_channel_tile(c, n, s, itemsize, budget_bytes):
    """Channel tile for the fused single-pass path, or None -> two-phase.

    Per-channel working set (bytes): double-buffered input + output blocks
    plus in-kernel f32 temporaries  ==  n*s*(4*itemsize + 8).
    """
    row_bytes = n * s * (4 * itemsize + 8)
    if row_bytes > budget_bytes:
        return None
    sub = _sublane(itemsize)
    if c % sub != 0:
        # Channel axis cannot be split (sublane rule); only full-C is legal.
        return c if c * row_bytes <= budget_bytes else None
    cands = [tc for tc in range(sub, c + 1, sub)
             if c % tc == 0 and tc * row_bytes <= budget_bytes]
    if not cands:
        return None
    target_block = 8 * 1024 * 1024          # ~1-8 MiB blocks pipeline well
    for steps in (8, 4, 2, 1):              # prefer >= 8 pipelined grid steps
        ok = [tc for tc in cands if c // tc >= steps]
        if ok:
            small = [tc for tc in ok if tc * row_bytes <= target_block]
            return max(small) if small else min(ok)
    return max(cands)


def _two_phase_tiles(c, s, itemsize, s_tile, budget_bytes):
    """(tc, ts) tiles for the two-phase path."""
    sub = _sublane(itemsize)
    bpe = 4 * itemsize + 8                  # 2x in + 2x out + f32 temps per element
    max_block = min(8 * 1024 * 1024, budget_bytes // 4)

    ts = max(128, (int(s_tile) // 128) * 128)   # lane-dense S tile
    if s <= ts:
        ts = s                              # full-extent S (always a legal last dim)

    if c % sub != 0:
        return c, ts                        # cannot split channels
    cap = max(sub, (max_block // max(ts * bpe, 1)) // sub * sub)
    cands = [t for t in range(sub, c + 1, sub) if c % t == 0 and t <= cap]
    if not cands:
        return sub, ts
    multi = [t for t in cands if c // t >= 2]   # keep both v7x TCs busy
    return (max(multi) if multi else max(cands)), ts


# ---------------------------------------------------------------------------
# Fused single-pass kernel: grid over channel tiles, full (N, S) per block.
# ---------------------------------------------------------------------------
def _bn_fused_kernel(x_ref, gamma_ref, beta_ref, o_ref, *, eps, count):
    # x_ref/o_ref: (N, tc, S)   gamma_ref/beta_ref: (tc, 1)
    x = x_ref[...].astype(jnp.float32)
    inv_m = jnp.float32(1.0 / count)

    # Per-channel mean over (N, S), f32 accumulation.
    mean = jnp.sum(jnp.sum(x, axis=2, keepdims=True),
                   axis=0, keepdims=True) * inv_m             # (1, tc, 1)
    # Biased variance in the centered (numerically stable) form; the centered
    # values are consumed inside the reduction and are not kept live after it.
    d = x - mean
    var = jnp.sum(jnp.sum(d * d, axis=2, keepdims=True),
                  axis=0, keepdims=True) * inv_m               # (1, tc, 1)

    gamma = gamma_ref[...].astype(jnp.float32)[None]           # (1, tc, 1)
    beta = beta_ref[...].astype(jnp.float32)[None]
    scale = gamma * jax.lax.rsqrt(var + jnp.float32(eps))
    shift = beta - mean * scale
    # Single FMA epilogue: no full-block temporary live through the store.
    o_ref[...] = (x * scale + shift).astype(o_ref.dtype)


def _bn_fused(x3, gamma2, beta2, eps, tc, vmem_limit):
    n, c, s = x3.shape
    grid = (c // tc,)
    return pl.pallas_call(
        partial(_bn_fused_kernel, eps=eps, count=n * s),
        out_shape=jax.ShapeDtypeStruct((n, c, s), x3.dtype),
        grid=grid,
        in_specs=[
            pl.BlockSpec((n, tc, s), lambda i: (0, i, 0)),
            pl.BlockSpec((tc, 1), lambda i: (i, 0)),
            pl.BlockSpec((tc, 1), lambda i: (i, 0)),
        ],
        out_specs=pl.BlockSpec((n, tc, s), lambda i: (0, i, 0)),
        compiler_params=pltpu.CompilerParams(
            dimension_semantics=("parallel",),
            vmem_limit_bytes=vmem_limit,
        ),
    )(x3, gamma2, beta2)


# ---------------------------------------------------------------------------
# Two-phase fallback: phase 1 = per-channel (shifted) sum / sumsq -> scale/shift
#                     phase 2 = streaming y = x * scale + shift
# ---------------------------------------------------------------------------
def _bn_stats_kernel(x_ref, gamma_ref, beta_ref, scale_ref, shift_ref,
                     acc_sum, acc_sq, pilot, *, eps, count, s_total, ts):
    ni = pl.program_id(1)
    si = pl.program_id(2)

    x = x_ref[0].astype(jnp.float32)                           # (tc, ts)

    @pl.when(jnp.logical_and(ni == 0, si == 0))
    def _():
        acc_sum[...] = jnp.zeros_like(acc_sum)
        acc_sq[...] = jnp.zeros_like(acc_sq)
        # Per-channel pilot shift: avoids catastrophic E[x^2]-mean^2
        # cancellation when |mean| >> std.  Column 0 of the first tile is
        # always a valid element.
        pilot[...] = x[:, 0:1]

    # Mask the (possibly partial) tail S tile so OOB columns never pollute the
    # sums; `count` is the true element count so zeros contribute nothing.
    col = jax.lax.broadcasted_iota(jnp.int32, x.shape, 1)
    valid = (si * ts + col) < s_total
    xs = jnp.where(valid, x - pilot[...], jnp.float32(0.0))
    acc_sum[...] += jnp.sum(xs, axis=1, keepdims=True)
    acc_sq[...] += jnp.sum(xs * xs, axis=1, keepdims=True)

    last = jnp.logical_and(ni == pl.num_programs(1) - 1,
                           si == pl.num_programs(2) - 1)

    @pl.when(last)
    def _():
        inv_m = jnp.float32(1.0 / count)
        mean_s = acc_sum[...] * inv_m                  # mean of shifted values
        var = acc_sq[...] * inv_m - mean_s * mean_s    # biased var (shift-invariant)
        mean = pilot[...] + mean_s
        gamma = gamma_ref[...].astype(jnp.float32)
        beta = beta_ref[...].astype(jnp.float32)
        scale = gamma * jax.lax.rsqrt(var + jnp.float32(eps))
        scale_ref[...] = scale
        shift_ref[...] = beta - mean * scale


def _bn_apply_kernel(x_ref, scale_ref, shift_ref, o_ref):
    # Partial tail blocks need no mask: OOB writes are dropped by Pallas.
    x = x_ref[0].astype(jnp.float32)
    o_ref[0] = (x * scale_ref[...] + shift_ref[...]).astype(o_ref.dtype)


def _bn_two_phase(x3, gamma2, beta2, eps, s_tile, budget_bytes, vmem_limit):
    n, c, s = x3.shape
    itemsize = jnp.dtype(x3.dtype).itemsize
    tc, ts = _two_phase_tiles(c, s, itemsize, s_tile, budget_bytes)
    grid = (c // tc, n, pl.cdiv(s, ts))
    count = n * s

    scale, shift = pl.pallas_call(
        partial(_bn_stats_kernel, eps=eps, count=count, s_total=s, ts=ts),
        out_shape=(jax.ShapeDtypeStruct((c, 1), jnp.float32),
                   jax.ShapeDtypeStruct((c, 1), jnp.float32)),
        grid=grid,
        in_specs=[
            pl.BlockSpec((1, tc, ts), lambda ci, ni, si: (ni, ci, si)),
            pl.BlockSpec((tc, 1), lambda ci, ni, si: (ci, 0)),
            pl.BlockSpec((tc, 1), lambda ci, ni, si: (ci, 0)),
        ],
        out_specs=(pl.BlockSpec((tc, 1), lambda ci, ni, si: (ci, 0)),
                   pl.BlockSpec((tc, 1), lambda ci, ni, si: (ci, 0))),
        scratch_shapes=[pltpu.VMEM((tc, 1), jnp.float32),
                        pltpu.VMEM((tc, 1), jnp.float32),
                        pltpu.VMEM((tc, 1), jnp.float32)],
        compiler_params=pltpu.CompilerParams(
            dimension_semantics=("parallel", "arbitrary", "arbitrary"),
            vmem_limit_bytes=vmem_limit,
        ),
    )(x3, gamma2, beta2)

    out = pl.pallas_call(
        _bn_apply_kernel,
        out_shape=jax.ShapeDtypeStruct((n, c, s), x3.dtype),
        grid=grid,
        in_specs=[
            pl.BlockSpec((1, tc, ts), lambda ci, ni, si: (ni, ci, si)),
            pl.BlockSpec((tc, 1), lambda ci, ni, si: (ci, 0)),
            pl.BlockSpec((tc, 1), lambda ci, ni, si: (ci, 0)),
        ],
        out_specs=pl.BlockSpec((1, tc, ts), lambda ci, ni, si: (ni, ci, si)),
        compiler_params=pltpu.CompilerParams(
            dimension_semantics=("parallel", "parallel", "parallel"),
            vmem_limit_bytes=vmem_limit,
        ),
    )(x3, scale, shift)
    return out


# ---------------------------------------------------------------------------
# Public wrapper (mirrors BatchNormNd.forward, training mode)
# ---------------------------------------------------------------------------
def batchnorm_nd(x, gamma, beta, eps=1e-5, *,
                 force_two_phase=False, s_tile=2048, fused_budget_bytes=None):
    """Training-mode BatchNorm{1,2,3}d forward; channel dim is axis 1."""
    if x.ndim < 2:
        raise ValueError("BatchNormNd expects input with ndim >= 2")
    n, c = int(x.shape[0]), int(x.shape[1])
    s = 1
    for d in x.shape[2:]:
        s *= int(d)
    s = max(s, 1)

    # Free reshape (preserves row-major contiguity; no HBM transpose).
    x3 = x.reshape(n, c, s)
    gamma2 = gamma.reshape(c, 1)
    beta2 = beta.reshape(c, 1)

    vmem_limit = _vmem_limit_bytes()
    budget = vmem_limit - vmem_limit // 8          # headroom under scoped limit
    itemsize = jnp.dtype(x.dtype).itemsize
    fused_budget = budget if fused_budget_bytes is None else int(fused_budget_bytes)

    tc = None if force_two_phase else _fused_channel_tile(c, n, s, itemsize,
                                                          fused_budget)
    if tc is not None:
        out3 = _bn_fused(x3, gamma2, beta2, eps, tc, vmem_limit)
    else:
        out3 = _bn_two_phase(x3, gamma2, beta2, eps, s_tile, budget, vmem_limit)
    return out3.reshape(x.shape)


def _reference_bn(x, gamma, beta, eps=1e-5):
    """Plain-JAX reference matching torch.nn.BatchNormNd in training mode."""
    axes = (0,) + tuple(range(2, x.ndim))
    mean = jnp.mean(x, axis=axes, keepdims=True)
    var = jnp.mean((x - mean) ** 2, axis=axes, keepdims=True)  # biased
    bshape = (1, x.shape[1]) + (1,) * (x.ndim - 2)
    g = gamma.reshape(bshape)
    b = beta.reshape(bshape)
    return (x - mean) * jax.lax.rsqrt(var + eps) * g + b


if __name__ == "__main__":
    key = jax.random.PRNGKey(0)
    (k_x4, k_x3, k_x5, k_x6, k_x7,
     k_g, k_b, k_g2, k_b2, k_g3, k_b3) = jax.random.split(key, 11)

    # ---- 4-D input -> BatchNorm2d path (NCHW), fused single-pass kernel ----
    N, C, H, W = 2, 4, 16, 16
    x4 = jax.random.normal(k_x4, (N, C, H, W), dtype=jnp.float32)
    gamma = 1.0 + 0.1 * jax.random.normal(k_g, (C,), dtype=jnp.float32)
    beta = 0.1 * jax.random.normal(k_b, (C,), dtype=jnp.float32)

    y4 = jax.block_until_ready(batchnorm_nd(x4, gamma, beta))
    ref4 = _reference_bn(x4, gamma, beta)
    assert y4.shape == x4.shape and y4.dtype == x4.dtype
    assert jnp.max(jnp.abs(y4 - ref4)) < 1e-4

    # ---- same input through the tiled two-phase fallback (S divisible) ----
    y4b = jax.block_until_ready(
        batchnorm_nd(x4, gamma, beta, force_two_phase=True, s_tile=128))
    assert jnp.max(jnp.abs(y4b - ref4)) < 1e-4

    # ---- two-phase fallback with a partial tail S tile (mask path) ----
    x6 = 3.0 + jax.random.normal(k_x6, (N, C, 10, 20), dtype=jnp.float32)
    y6 = jax.block_until_ready(
        batchnorm_nd(x6, gamma, beta, force_two_phase=True, s_tile=128))
    ref6 = _reference_bn(x6, gamma, beta)
    assert jnp.max(jnp.abs(y6 - ref6)) < 1e-4

    # ---- 3-D input -> BatchNorm1d path (N, C, L) ----
    L = 8
    x3 = jax.random.normal(k_x3, (N, C, L), dtype=jnp.float32)
    y3 = jax.block_until_ready(batchnorm_nd(x3, gamma, beta))
    ref3 = _reference_bn(x3, gamma, beta)
    assert y3.shape == x3.shape
    assert jnp.max(jnp.abs(y3 - ref3)) < 1e-4

    # ---- channel-tiled fused path (C multiple of 8, small fused budget) ----
    C2 = 16
    x5 = jax.random.normal(k_x5, (N, C2, 8, 8), dtype=jnp.float32)
    gamma2 = 1.0 + 0.1 * jax.random.normal(k_g2, (C2,), dtype=jnp.float32)
    beta2 = 0.1 * jax.random.normal(k_b2, (C2,), dtype=jnp.float32)
    y5 = jax.block_until_ready(
        batchnorm_nd(x5, gamma2, beta2, fused_budget_bytes=64 * 1024))
    ref5 = _reference_bn(x5, gamma2, beta2)
    assert jnp.max(jnp.abs(y5 - ref5)) < 1e-4

    # ---- bf16 input (dtype-aware sublane tiling: channel tile multiple of 16) ----
    C3 = 32
    x7 = jax.random.normal(k_x7, (N, C3, 8, 8), dtype=jnp.bfloat16)
    gamma3 = 1.0 + 0.1 * jax.random.normal(k_g3, (C3,), dtype=jnp.float32)
    beta3 = 0.1 * jax.random.normal(k_b3, (C3,), dtype=jnp.float32)
    y7 = jax.block_until_ready(batchnorm_nd(x7, gamma3, beta3))
    ref7 = _reference_bn(x7.astype(jnp.float32), gamma3, beta3)
    assert y7.dtype == jnp.bfloat16
    assert jnp.max(jnp.abs(y7.astype(jnp.float32) - ref7)) < 5e-2

    # TODO(synk): running_mean/running_var tracking (eval-mode statistics) is
    # PyTorch module state and is not part of this single forward pass.
    print("KERNEL_OK")
</pallas_src>

<mosaic_0001>
module attributes {stable_mosaic.version = 11 : i64} {
  func.func @_bn_fused_kernel(%arg0: i32, %arg1: memref<2x4x256xf32, #tpu.memory_space<vmem>>, %arg2: memref<4x1xf32, #tpu.memory_space<vmem>>, %arg3: memref<4x1xf32, #tpu.memory_space<vmem>>, %arg4: memref<2x4x256xf32, #tpu.memory_space<vmem>>) attributes {dimension_semantics = [#tpu.dimension_semantics<parallel>], iteration_bounds = array<i64: 1>, scalar_prefetch = 0 : i64, scratch_operands = 0 : i64, tpu.core_type = #tpu.core_type<tc>, window_params = [{transform_indices = @transform_0, window_bounds = array<i64: 2, 4, 256>}, {transform_indices = @transform_1, window_bounds = array<i64: 4, 1>}, {transform_indices = @transform_2, window_bounds = array<i64: 4, 1>}, {transform_indices = @transform_3, window_bounds = array<i64: 2, 4, 256>}]} {
    %c0 = arith.constant 0 : index
    %c0_0 = arith.constant 0 : index
    %c0_1 = arith.constant 0 : index
    %0 = vector.load %arg1[%c0, %c0_0, %c0_1] : memref<2x4x256xf32, #tpu.memory_space<vmem>>, vector<2x4x256xf32>
    %cst = arith.constant dense<0.000000e+00> : vector<2x4xf32>
    %1 = vector.multi_reduction <add>, %0, %cst [2] : vector<2x4x256xf32> to vector<2x4xf32>
    %2 = vector.shape_cast %1 : vector<2x4xf32> to vector<2x4x1xf32>
    %cst_2 = arith.constant dense<0.000000e+00> : vector<4x1xf32>
    %3 = vector.multi_reduction <add>, %2, %cst_2 [0] : vector<2x4x1xf32> to vector<4x1xf32>
    %4 = vector.shape_cast %3 : vector<4x1xf32> to vector<1x4x1xf32>
    %cst_3 = arith.constant 0.001953125 : f32
    %5 = vector.broadcast %cst_3 : f32 to vector<1x4x1xf32>
    %6 = arith.mulf %4, %5 : vector<1x4x1xf32>
    %7 = vector.broadcast %6 : vector<1x4x1xf32> to vector<2x4x256xf32>
    %8 = arith.subf %0, %7 : vector<2x4x256xf32>
    %9 = arith.mulf %8, %8 : vector<2x4x256xf32>
    %cst_4 = arith.constant dense<0.000000e+00> : vector<2x4xf32>
    %10 = vector.multi_reduction <add>, %9, %cst_4 [2] : vector<2x4x256xf32> to vector<2x4xf32>
    %11 = vector.shape_cast %10 : vector<2x4xf32> to vector<2x4x1xf32>
    %cst_5 = arith.constant dense<0.000000e+00> : vector<4x1xf32>
    %12 = vector.multi_reduction <add>, %11, %cst_5 [0] : vector<2x4x1xf32> to vector<4x1xf32>
    %13 = vector.shape_cast %12 : vector<4x1xf32> to vector<1x4x1xf32>
    %cst_6 = arith.constant 0.001953125 : f32
    %14 = vector.broadcast %cst_6 : f32 to vector<1x4x1xf32>
    %15 = arith.mulf %13, %14 : vector<1x4x1xf32>
    %c0_7 = arith.constant 0 : index
    %c0_8 = arith.constant 0 : index
    %16 = vector.load %arg2[%c0_7, %c0_8] : memref<4x1xf32, #tpu.memory_space<vmem>>, vector<4x1xf32>
    %17 = vector.shape_cast %16 : vector<4x1xf32> to vector<1x4x1xf32>
    %c0_9 = arith.constant 0 : index
    %c0_10 = arith.constant 0 : index
    %18 = vector.load %arg3[%c0_9, %c0_10] : memref<4x1xf32, #tpu.memory_space<vmem>>, vector<4x1xf32>
    %19 = vector.shape_cast %18 : vector<4x1xf32> to vector<1x4x1xf32>
    %cst_11 = arith.constant 9.99999974E-6 : f32
    %20 = vector.broadcast %cst_11 : f32 to vector<1x4x1xf32>
    %21 = arith.addf %15, %20 : vector<1x4x1xf32>
    %22 = math.rsqrt %21 : vector<1x4x1xf32>
    %23 = arith.mulf %17, %22 : vector<1x4x1xf32>
    %24 = arith.mulf %6, %23 : vector<1x4x1xf32>
    %25 = arith.subf %19, %24 : vector<1x4x1xf32>
    %26 = vector.broadcast %23 : vector<1x4x1xf32> to vector<2x4x256xf32>
    %27 = arith.mulf %0, %26 : vector<2x4x256xf32>
    %28 = vector.broadcast %25 : vector<1x4x1xf32> to vector<2x4x256xf32>
    %29 = arith.addf %27, %28 : vector<2x4x256xf32>
    %c0_12 = arith.constant 0 : index
    %c0_13 = arith.constant 0 : index
    %c0_14 = arith.constant 0 : index
    %30 = vector.load %arg4[%c0_12, %c0_13, %c0_14] : memref<2x4x256xf32, #tpu.memory_space<vmem>>, vector<2x4x256xf32>
    tpu.vector_store %arg4[%c0_12, %c0_13, %c0_14], %29 {strides = array<i32>} : memref<2x4x256xf32, #tpu.memory_space<vmem>>, vector<2x4x256xf32>,
    return
  }
  func.func @transform_0(%arg0: i32) -> (i32, i32, i32) {
    %c0_i32 = arith.constant 0 : i32
    %c0_i32_0 = arith.constant 0 : i32
    %c0_i32_1 = arith.constant 0 : i32
    return %c0_i32, %arg0, %c0_i32_0 : i32, i32, i32
  }
  func.func @transform_1(%arg0: i32) -> (i32, i32) {
    %c0_i32 = arith.constant 0 : i32
    %c0_i32_0 = arith.constant 0 : i32
    return %arg0, %c0_i32 : i32, i32
  }
  func.func @transform_2(%arg0: i32) -> (i32, i32) {
    %c0_i32 = arith.constant 0 : i32
    %c0_i32_0 = arith.constant 0 : i32
    return %arg0, %c0_i32 : i32, i32
  }
  func.func @transform_3(%arg0: i32) -> (i32, i32, i32) {
    %c0_i32 = arith.constant 0 : i32
    %c0_i32_0 = arith.constant 0 : i32
    %c0_i32_1 = arith.constant 0 : i32
    return %c0_i32, %arg0, %c0_i32_0 : i32, i32, i32
  }
}

</mosaic_0001>

<bundles_post_ra>
// kernel: tpu_custom_call.1
= control target key start
LH: loop header
LB: loop body
LE: loop exit
PB: predicated region body
PF: predicated region fallthrough
CT: control target
= control target key end

     0   :  { %8 = vsyncpa [#allocation3], 0  ;;  %s287_s0 = inlined_call_operand.hbm [shape: f32[2,4,256], index: 0, kind: input, shape index: {}]   ;;  %s288_s1 = inlined_call_operand.vmem [shape: f32[4,1], index: 1, kind: input, shape index: {}]   ;;  %s289_s2 = inlined_call_operand.vmem [shape: f32[4,1], index: 2, kind: input, shape index: {}]   ;;  %s290_s3 = inlined_call_operand.hbm [shape: f32[2,4,256], index: 3, kind: output, shape index: {}]  }
   0x1   :  { %9 = vsyncpa [#allocation4], 0  ;;  %s199_s12 = smov [#allocation2]   ;;  %s151_s16 = scalar_lea.hbm %s287_s0, 256 }
   0x2   :  { %s15_s13 = sshll.u32 %s199_s12, 4  ;;  %p152_p0 = scmp.ne.s32.totalorder %s287_s0, %s151_s16  ;;  %s16_s13 = int_to_ptr.vmem [resolvable:$true] %s15_s13 }
   0x3   :  { %p155_p1 = scmp.lt.u32.totalorder %s151_s16, %s287_s0 }
   0x5   :  { %p157_p2 = pnand %p155_p1, %p152_p0 }
   0x7   :  { %160 = shalt.err (!%p157_p2)
}
   0x8   :  { %s161_s21 = scalar_lea.vmem %s16_s13, 256  ;;  %p166_p4 = scmp.lt.s32.totalorder %s16_s13, %s16_s13 }
   0x9   :  { %p162_p3 = scmp.ne.s32.totalorder %s16_s13, %s161_s21  ;;  %p167_p5 = scmp.lt.s32.totalorder %s161_s21, %s161_s21 }
   0xb   :  { %p168_p6 = por %p167_p5, %p166_p4 }
   0xd   :  { %p169_p7 = pnand %p168_p6, %p162_p3 }
   0xf   :  { %172 = shalt.err (!%p169_p7)
}
  0x10   :  { %s200_s22 = smov 128   ;;  %s201_s23 = smov 8  }
  0x11   :  { %21 = dma.hbm_to_vmem [thread:$0]  %s287_s0, 256, %s16_s13, [#allocation3], %s200_s22, %s200_s22, %s201_s23  }
  0x12   :  { %195 = dma.done.wait [#allocation3], 256  }
  0x13   :  { %196 = vsyncadd [#allocation3], 4294967040  ;;  %vm37_vm0 = vcmask 1043456   ;;  %v240_v0 = vld [vmem:[#allocation2] sm:$0xff]  ;;  %v242_v1 = vld [vmem:[#allocation2 + $0x8] sm:$0xff]  ;;  %v56_v12 = vlaneseq  ;;  %v203_v35 = vmov 0  }
  0x14   :  { %v33_v2 = vcombine.high %v240_v0, %v240_v0  ;;  %v38_v3 = vsel %vm37_vm0, %v240_v0, 0.0  ;;  %v34_v4 = vcombine.high %v242_v1, %v242_v1  ;;  %v43_v6 = vsel %vm37_vm0, %v242_v1, 0.0  ;;  %145 = vset.pattern.permute.xlu0 %v203_v35  ;;  %146 = vset.pattern.permute.xlu1 %v203_v35  ;;  %v85_v43 = vld [vmem:[%s288_s1] sm:$0xf]  ;;  %s204_s29 = smov [#allocation5]  }
  0x15   :  { %v202_v10 = vmov 839922192   ;;  %v57_v15 = vshrl.u32 %v56_v12, 7  ;;  %v86_v46 = vld [vmem:[%s289_s2] sm:$0xf]  ;;  %s127_s30 = sshll.u32 %s204_s29, 4  ;;  %s128_s30 = int_to_ptr.vmem [resolvable:$true] %s127_s30 }
  0x16   :  { %v39_v5 = vsel %vm37_vm0, %v33_v2, 0.0  ;;  %v44_v7 = vsel %vm37_vm0, %v34_v4, 0.0  ;;  %v54_v11 = vunpack.c.l.s4 %v202_v10  ;;  %s173_s1 = scalar_lea.vmem %s128_s30, 256  ;;  %p178_p9 = scmp.lt.s32.totalorder %s128_s30, %s128_s30 }
  0x17   :  { %v40_v8 = vadd.f32 %v39_v5, %v38_v3  ;;  %v45_v9 = vadd.f32 %v44_v7, %v43_v6  ;;  %p174_p8 = scmp.ne.s32.totalorder %s128_s30, %s173_s1  ;;  %p179_p10 = scmp.lt.s32.totalorder %s173_s1, %s173_s1 }
  0x18   :  { %v55_v14 = vunpack.c.0.s8 %v54_v11 }
  0x19   :  { %41 = vadd.xlane.f32.xlu0 %v40_v8  ;;  %p180_p11 = por %p179_p10, %p178_p9 }
  0x1a   :  { %v58_v19 = vsub.s32 %v55_v14, %v57_v15 }
  0x1b   :  { %p181_p12 = pnand %p180_p11, %p174_p8 }
  0x1d   :  { %46 = vadd.xlane.f32.xlu0 %v45_v9 }
  0xa6   :  { %v42_v13 = vpop.xlane.xlu0 %41 }
  0xa7   :  { %v48_v17 = vsel %vm37_vm0, %v42_v13, 0.0 }
  0xaa   :  { %v47_v16 = vpop.xlane.xlu0 %46 }
  0xab   :  { %v49_v18 = vsel %vm37_vm0, %v47_v16, 0.0 }
  0xac   :  { %v50_v20 = vadd.f32 %v49_v18, %v48_v17 }
  0xae   :  { %v51_v21 = vmul.f32 0.001953125, %v50_v20 }
  0xb0   :  { %v59_v22 = vrot.slane %v51_v21, %v58_v19 }
  0xb2   :  { %v61_v23 = vsub.f32 %v240_v0, %v59_v22  ;;  %v62_v24 = vsub.f32 %v242_v1, %v59_v22 }
  0xb4   :  { %v63_v25 = vmul.f32 %v61_v23, %v61_v23  ;;  %v64_v26 = vmul.f32 %v62_v24, %v62_v24 }
  0xb6   :  { %v67_v27 = vcombine.high %v63_v25, %v63_v25  ;;  %v68_v28 = vcombine.high %v64_v26, %v64_v26  ;;  %v71_v29 = vsel %vm37_vm0, %v63_v25, 0.0  ;;  %v76_v33 = vsel %vm37_vm0, %v64_v26, 0.0 }
  0xb8   :  { %v72_v30 = vsel %vm37_vm0, %v67_v27, 0.0  ;;  %v77_v32 = vsel %vm37_vm0, %v68_v28, 0.0 }
  0xb9   :  { %v73_v31 = vadd.f32 %v72_v30, %v71_v29  ;;  %v78_v34 = vadd.f32 %v77_v32, %v76_v33 }
  0xbb   :  { %74 = vadd.xlane.f32.xlu1 %v73_v31 }
  0xbf   :  { %79 = vadd.xlane.f32.xlu1 %v78_v34 }
 0x148   :  { %v75_v36 = vpop.xlane.xlu1 %74 }
 0x149   :  { %v81_v38 = vsel %vm37_vm0, %v75_v36, 0.0 }
 0x14c   :  { %v80_v37 = vpop.xlane.xlu1 %79 }
 0x14d   :  { %v82_v39 = vsel %vm37_vm0, %v80_v37, 0.0 }
 0x14e   :  { %v83_v40 = vadd.f32 %v82_v39, %v81_v38 }
 0x150   :  { %v84_v41 = vmul.f32 0.001953125, %v83_v40 }
 0x152   :  { %v87_v42 = vadd.f32 1e-05, %v84_v41 }
 0x154   :  { %149 = vrsqrt.f32 %v87_v42 }
 0x15e   :  { %v150_v44 = vpop.eup %149 }
 0x15f   :  { %v89_v45 = vmul.f32 %v150_v44, %v85_v43 }
 0x161   :  { %94 = vperm.xlu0 %145, %v89_v45   ;;  %v90_v47 = vmul.f32 %v89_v45, %v51_v21 }
 0x163   :  { %v91_v48 = vsub.f32 %v86_v46, %v90_v47 }
 0x165   :  { %108 = vperm.xlu1 %146, %v91_v48  }
 0x1e0   :  { %v95_v49 = vpop.permute.xlu0 %94 }
 0x1e1   :  { %v102_v50 = vrot.slane %v95_v49, %v58_v19 }
 0x1e3   :  { %v104_v52 = vmul.f32 %v102_v50, %v240_v0  ;;  %v105_v53 = vmul.f32 %v102_v50, %v242_v1 }
 0x1e4   :  { %v109_v51 = vpop.permute.xlu1 %108 }
 0x1e5   :  { %v116_v54 = vrot.slane %v109_v51, %v58_v19 }
 0x1e7   :  { %v118_v55 = vadd.f32 %v116_v54, %v104_v52  ;;  %v119_v56 = vadd.f32 %v116_v54, %v105_v53 }
 0x1e9   :  { %120 = vst [vmem:[#allocation5] sm:$0xff] %v118_v55  ;;  %121 = vst [vmem:[#allocation5 + $0x8] sm:$0xff] %v119_v56 }
 0x1ea   :  { %184 = shalt.err (!%p181_p12)
}
 0x1eb   :  { %s185_s5 = scalar_lea.hbm %s290_s3, 256 }
 0x1ec   :  { %p186_p13 = scmp.ne.s32.totalorder %s290_s3, %s185_s5  ;;  %p189_p0 = scmp.lt.u32.totalorder %s185_s5, %s290_s3 }
 0x1ee   :  { %p191_p1 = pnand %p189_p0, %p186_p13 }
 0x1f0   :  { %194 = shalt.err (!%p191_p1)
}
 0x1f1   :  { %133 = dma.vmem_to_hbm [thread:$0]  %s128_s30, 256, %s290_s3, [#allocation4], %s200_s22, %s200_s22, %s201_s23  }
 0x1f2   :  { %197 = dma.done.wait [#allocation4], 256  }
 0x1f3   :  { %198 = vsyncadd [#allocation4], 4294967040 }
 0x1f4   :  { %137 = vsyncpa [#allocation3], 1 }
 0x1f5   :  { %138 = vsyncpa [#allocation4], 1 }

</bundles_post_ra>
